<compile_context>
chip_gen: v7x
topology: tpu7x:2x2x1
jax: 0.10.0
libtpu: 0.0.40
codegen_flags: <defaults>
</compile_context>

<pallas_src>
import math

import jax
import jax.numpy as jnp
from jax.experimental import pallas as pl
from jax.experimental.pallas import tpu as pltpu

MASK_VALUE = -1e30  # large finite negative: exp() underflows to 0, no inf-inf NaNs


def _pick_tile(dim, target, align):
    """Largest multiple of `align` that divides `dim` and is <= target; else full dim."""
    if dim <= target:
        return dim
    best = None
    t = align
    while t <= target:
        if dim % t == 0:
            best = t
        t += align
    return best if best is not None else dim


# ----------------------------------------------------------------------------
# Kernel 1: tiled linear  y = x @ W + b   (bf16 MXU, f32 accumulation)
# ----------------------------------------------------------------------------
def _linear_kernel(x_ref, w_ref, b_ref, o_ref, acc_ref):
    k = pl.program_id(2)

    @pl.when(k == 0)
    def _init():
        acc_ref[...] = jnp.zeros_like(acc_ref)

    acc_ref[...] += jnp.dot(
        x_ref[...].astype(jnp.bfloat16),
        w_ref[...].astype(jnp.bfloat16),
        preferred_element_type=jnp.float32,
    )

    @pl.when(k == pl.num_programs(2) - 1)
    def _finalize():
        o_ref[...] = (acc_ref[...] + b_ref[...]).astype(o_ref.dtype)


def linear_pallas(x2d, w, b, *, tm=256, tn=512, tk=512):
    M, K = x2d.shape
    K2, N = w.shape
    assert K == K2
    tm = _pick_tile(M, tm, 8)
    tn = _pick_tile(N, tn, 128)
    tk = _pick_tile(K, tk, 128)
    grid = (M // tm, N // tn, K // tk)

    cost = pl.CostEstimate(
        flops=2 * M * N * K,
        transcendentals=0,
        bytes_accessed=4 * (M * K + K * N + M * N + N),
    )
    return pl.pallas_call(
        _linear_kernel,
        out_shape=jax.ShapeDtypeStruct((M, N), jnp.float32),
        grid=grid,
        in_specs=[
            pl.BlockSpec((tm, tk), lambda i, j, k: (i, k)),
            pl.BlockSpec((tk, tn), lambda i, j, k: (k, j)),
            pl.BlockSpec((1, tn), lambda i, j, k: (0, j)),
        ],
        out_specs=pl.BlockSpec((tm, tn), lambda i, j, k: (i, j)),
        scratch_shapes=[pltpu.VMEM((tm, tn), jnp.float32)],
        compiler_params=pltpu.CompilerParams(
            dimension_semantics=("parallel", "parallel", "arbitrary"),
            vmem_limit_bytes=32 * 1024 * 1024,
        ),
        cost_estimate=cost,
    )(x2d, w, b.reshape(1, N))


# ----------------------------------------------------------------------------
# Kernel 2: flash-style causal attention, all heads per block, online softmax
# grid = (B, T//tq, T//tkv); kv axis is the (arbitrary) reduction axis.
# ----------------------------------------------------------------------------
def _flash_attn_kernel(q_ref, k_ref, v_ref, o_ref, m_ref, l_ref, acc_ref):
    _, H, tq, D = q_ref.shape
    tkv = k_ref.shape[2]
    qi = pl.program_id(1)
    kvi = pl.program_id(2)

    @pl.when(kvi == 0)
    def _init():
        m_ref[...] = jnp.full_like(m_ref, MASK_VALUE)
        l_ref[...] = jnp.zeros_like(l_ref)
        acc_ref[...] = jnp.zeros_like(acc_ref)

    # Causal block skipping: this kv block contributes only if its first key
    # index is <= the last query index of the current q block.
    q_last = (qi + 1) * tq - 1
    kv_first = kvi * tkv

    @pl.when(kv_first <= q_last)
    def _compute():
        scale = 1.0 / math.sqrt(D)
        q = (q_ref[0].astype(jnp.float32) * scale).astype(jnp.bfloat16)  # (H,tq,D)
        k = k_ref[0].astype(jnp.bfloat16)                                # (H,tkv,D)
        v = v_ref[0].astype(jnp.bfloat16)                                # (H,tkv,D)

        # scores in f32
        s = jnp.einsum("hqd,hkd->hqk", q, k, preferred_element_type=jnp.float32)

        # causal mask (element-level, only matters on the diagonal band)
        q_pos = qi * tq + jax.lax.broadcasted_iota(jnp.int32, (H, tq, tkv), 1)
        k_pos = kvi * tkv + jax.lax.broadcasted_iota(jnp.int32, (H, tq, tkv), 2)
        s = jnp.where(k_pos <= q_pos, s, MASK_VALUE)

        # online softmax update (f32 statistics)
        m_prev = m_ref[...]
        m_new = jnp.maximum(m_prev, jnp.max(s, axis=-1, keepdims=True))
        alpha = jnp.exp(m_prev - m_new)
        p = jnp.exp(s - m_new)
        l_ref[...] = alpha * l_ref[...] + jnp.sum(p, axis=-1, keepdims=True)
        acc_ref[...] = alpha * acc_ref[...] + jnp.einsum(
            "hqk,hkd->hqd", p.astype(jnp.bfloat16), v,
            preferred_element_type=jnp.float32,
        )
        m_ref[...] = m_new

    @pl.when(kvi == pl.num_programs(2) - 1)
    def _finalize():
        inv_l = pl.reciprocal(l_ref[...], approx=True)
        o_ref[0] = (acc_ref[...] * inv_l).astype(o_ref.dtype)


def flash_attention_pallas(q, k, v, *, tq=128, tkv=128):
    # q, k, v: [B, H, T, D]
    B, H, T, D = q.shape
    tq = _pick_tile(T, tq, 8)
    tkv = _pick_tile(T, tkv, 8)
    grid = (B, T // tq, T // tkv)

    cost = pl.CostEstimate(
        flops=4 * B * H * T * T * D,
        transcendentals=B * H * T * T,
        bytes_accessed=4 * 4 * B * H * T * D,
    )
    q_spec = pl.BlockSpec((1, H, tq, D), lambda b, qi, kvi: (b, 0, qi, 0))
    kv_spec = pl.BlockSpec((1, H, tkv, D), lambda b, qi, kvi: (b, 0, kvi, 0))
    o_spec = pl.BlockSpec((1, H, tq, D), lambda b, qi, kvi: (b, 0, qi, 0))

    return pl.pallas_call(
        _flash_attn_kernel,
        out_shape=jax.ShapeDtypeStruct((B, H, T, D), jnp.float32),
        grid=grid,
        in_specs=[q_spec, kv_spec, kv_spec],
        out_specs=o_spec,
        scratch_shapes=[
            pltpu.VMEM((H, tq, 1), jnp.float32),   # running max m
            pltpu.VMEM((H, tq, 1), jnp.float32),   # running sum l
            pltpu.VMEM((H, tq, D), jnp.float32),   # output accumulator
        ],
        compiler_params=pltpu.CompilerParams(
            dimension_semantics=("parallel", "parallel", "arbitrary"),
            vmem_limit_bytes=32 * 1024 * 1024,
        ),
        cost_estimate=cost,
    )(q, k, v)


# ----------------------------------------------------------------------------
# CausalSelfAttention forward (glue in plain JAX, hot paths in Pallas)
# ----------------------------------------------------------------------------
def causal_self_attention(x, w_attn, b_attn, w_proj, b_proj, n_head):
    B, T, C = x.shape
    D = C // n_head

    # qkv = self.c_attn(x)
    qkv = linear_pallas(x.reshape(B * T, C), w_attn, b_attn)        # [B*T, 3C]
    qkv = qkv.reshape(B, T, 3, n_head, D)
    # Single head-major transpose covering q, k and v at once.
    # TODO(synk): remove this and the output transpose entirely by index-mapping the
    # attention BlockSpecs over the [B, T, 3, H, D] layout (kept as XLA transposes here
    # for lowering robustness).
    qkv = qkv.transpose(0, 2, 3, 1, 4)                               # [B, 3, H, T, D]
    q, k, v = qkv[:, 0], qkv[:, 1], qkv[:, 2]                        # [B, H, T, D]

    # F.scaled_dot_product_attention(..., is_causal=True)
    o = flash_attention_pallas(q, k, v)                              # [B, H, T, D]

    # transpose(1,2).view(B, T, C) then c_proj
    o = o.transpose(0, 2, 1, 3).reshape(B * T, C)
    out = linear_pallas(o, w_proj, b_proj)                           # [B*T, C]
    return out.reshape(B, T, C)


# ----------------------------------------------------------------------------
# Pure-JAX f32 reference for the correctness check
# ----------------------------------------------------------------------------
def reference_attention(x, w_attn, b_attn, w_proj, b_proj, n_head):
    B, T, C = x.shape
    D = C // n_head
    qkv = x @ w_attn + b_attn
    q, k, v = jnp.split(qkv, 3, axis=2)

    def to_heads(a):
        return a.reshape(B, T, n_head, D).transpose(0, 2, 1, 3)

    q, k, v = to_heads(q), to_heads(k), to_heads(v)
    s = jnp.einsum("bhqd,bhkd->bhqk", q, k) / math.sqrt(D)
    mask = jnp.tril(jnp.ones((T, T), dtype=bool))
    s = jnp.where(mask[None, None], s, -jnp.inf)
    p = jax.nn.softmax(s, axis=-1)
    o = jnp.einsum("bhqk,bhkd->bhqd", p, v)
    o = o.transpose(0, 2, 1, 3).reshape(B, T, C)
    return o @ w_proj + b_proj


if __name__ == "__main__":
    # Small config consistent with the module: n_embd divisible by n_head.
    B, T, C, H = 2, 8, 32, 4

    key = jax.random.PRNGKey(0)
    kx, kwa, kwp = jax.random.split(key, 3)

    x = jax.random.normal(kx, (B, T, C), dtype=jnp.float32)
    # Deterministic parameter init (std=0.02 normals, zero biases),
    # matching GPT2Model._init_weights semantics.
    w_attn = 0.02 * jax.random.normal(kwa, (C, 3 * C), dtype=jnp.float32)
    b_attn = jnp.zeros((3 * C,), dtype=jnp.float32)
    w_proj = 0.02 * jax.random.normal(kwp, (C, C), dtype=jnp.float32)
    b_proj = jnp.zeros((C,), dtype=jnp.float32)

    out = causal_self_attention(x, w_attn, b_attn, w_proj, b_proj, H)
    out = jax.block_until_ready(out)

    ref = reference_attention(x, w_attn, b_attn, w_proj, b_proj, H)
    assert out.shape == (B, T, C)
    # bf16 MXU operands (f32 accumulation) -> relaxed tolerance vs the f32 reference.
    max_err = float(jnp.max(jnp.abs(out - ref)))
    assert max_err < 2e-2, f"mismatch vs reference: max abs err {max_err}"

    print("KERNEL_OK")
</pallas_src>

<mosaic_0001>
module attributes {stable_mosaic.version = 11 : i64} {
  func.func @_linear_kernel(%arg0: i32, %arg1: i32, %arg2: i32, %arg3: memref<16x32xf32, #tpu.memory_space<vmem>>, %arg4: memref<32x96xf32, #tpu.memory_space<vmem>>, %arg5: memref<1x96xf32, #tpu.memory_space<vmem>>, %arg6: memref<16x96xf32, #tpu.memory_space<vmem>>, %arg7: memref<16x96xf32, #tpu.memory_space<vmem>>) attributes {dimension_semantics = [#tpu.dimension_semantics<parallel>, #tpu.dimension_semantics<parallel>, #tpu.dimension_semantics<arbitrary>], iteration_bounds = array<i64: 1, 1, 1>, scalar_prefetch = 0 : i64, scratch_operands = 1 : i64, tpu.core_type = #tpu.core_type<tc>, window_params = [{transform_indices = @transform_0, window_bounds = array<i64: 16, 32>}, {transform_indices = @transform_1, window_bounds = array<i64: 32, 96>}, {transform_indices = @transform_2, window_bounds = array<i64: 1, 96>}, {transform_indices = @transform_3, window_bounds = array<i64: 16, 96>}]} {
    %c0_i32 = arith.constant 0 : i32
    %0 = arith.cmpi eq, %arg2, %c0_i32 : i32
    %1 = arith.extui %0 : i1 to i32
    %c0_i32_0 = arith.constant 0 : i32
    %2 = arith.cmpi ne, %1, %c0_i32_0 : i32
    scf.if %2 {
      %cst_10 = arith.constant 0.000000e+00 : f32
      %14 = vector.broadcast %cst_10 : f32 to vector<16x96xf32>
      %c0_11 = arith.constant 0 : index
      %c0_12 = arith.constant 0 : index
      %15 = vector.load %arg7[%c0_11, %c0_12] : memref<16x96xf32, #tpu.memory_space<vmem>>, vector<16x96xf32>
      tpu.vector_store %arg7[%c0_11, %c0_12], %14 {strides = array<i32>} : memref<16x96xf32, #tpu.memory_space<vmem>>, vector<16x96xf32>,
    } else {
    }
    %c0 = arith.constant 0 : index
    %c0_1 = arith.constant 0 : index
    %3 = vector.load %arg7[%c0, %c0_1] : memref<16x96xf32, #tpu.memory_space<vmem>>, vector<16x96xf32>
    %c0_2 = arith.constant 0 : index
    %c0_3 = arith.constant 0 : index
    %4 = vector.load %arg3[%c0_2, %c0_3] : memref<16x32xf32, #tpu.memory_space<vmem>>, vector<16x32xf32>
    %5 = arith.truncf %4 : vector<16x32xf32> to vector<16x32xbf16>
    %c0_4 = arith.constant 0 : index
    %c0_5 = arith.constant 0 : index
    %6 = vector.load %arg4[%c0_4, %c0_5] : memref<32x96xf32, #tpu.memory_space<vmem>>, vector<32x96xf32>
    %7 = arith.truncf %6 : vector<32x96xf32> to vector<32x96xbf16>
    %cst = arith.constant dense<0.000000e+00> : vector<16x96xf32>
    %8 = tpu.matmul %5, %7, %cst {dimension_numbers = #tpu.dot_dimension_numbers<[1], [0], [0], [1], [0, 0, 1, 1], [], []>} : vector<16x32xbf16>, vector<32x96xbf16>, vector<16x96xf32> -> vector<16x96xf32>
    %9 = arith.addf %3, %8 : vector<16x96xf32>
    %c0_6 = arith.constant 0 : index
    %c0_7 = arith.constant 0 : index
    %10 = vector.load %arg7[%c0_6, %c0_7] : memref<16x96xf32, #tpu.memory_space<vmem>>, vector<16x96xf32>
    tpu.vector_store %arg7[%c0_6, %c0_7], %9 {strides = array<i32>} : memref<16x96xf32, #tpu.memory_space<vmem>>, vector<16x96xf32>,
    %c0_i32_8 = arith.constant 0 : i32
    %11 = arith.cmpi eq, %arg2, %c0_i32_8 : i32
    %12 = arith.extui %11 : i1 to i32
    %c0_i32_9 = arith.constant 0 : i32
    %13 = arith.cmpi ne, %12, %c0_i32_9 : i32
    scf.if %13 {
      %c0_10 = arith.constant 0 : index
      %c0_11 = arith.constant 0 : index
      %14 = vector.load %arg7[%c0_10, %c0_11] : memref<16x96xf32, #tpu.memory_space<vmem>>, vector<16x96xf32>
      %c0_12 = arith.constant 0 : index
      %c0_13 = arith.constant 0 : index
      %15 = vector.load %arg5[%c0_12, %c0_13] : memref<1x96xf32, #tpu.memory_space<vmem>>, vector<1x96xf32>
      %16 = vector.broadcast %15 : vector<1x96xf32> to vector<16x96xf32>
      %17 = arith.addf %14, %16 : vector<16x96xf32>
      %c0_14 = arith.constant 0 : index
      %c0_15 = arith.constant 0 : index
      %18 = vector.load %arg6[%c0_14, %c0_15] : memref<16x96xf32, #tpu.memory_space<vmem>>, vector<16x96xf32>
      tpu.vector_store %arg6[%c0_14, %c0_15], %17 {strides = array<i32>} : memref<16x96xf32, #tpu.memory_space<vmem>>, vector<16x96xf32>,
    } else {
    }
    return
  }
  func.func @transform_0(%arg0: i32, %arg1: i32, %arg2: i32) -> (i32, i32) {
    %c0_i32 = arith.constant 0 : i32
    return %arg0, %arg2 : i32, i32
  }
  func.func @transform_1(%arg0: i32, %arg1: i32, %arg2: i32) -> (i32, i32) {
    %c0_i32 = arith.constant 0 : i32
    return %arg2, %arg1 : i32, i32
  }
  func.func @transform_2(%arg0: i32, %arg1: i32, %arg2: i32) -> (i32, i32) {
    %c0_i32 = arith.constant 0 : i32
    %c0_i32_0 = arith.constant 0 : i32
    return %c0_i32, %arg1 : i32, i32
  }
  func.func @transform_3(%arg0: i32, %arg1: i32, %arg2: i32) -> (i32, i32) {
    %c0_i32 = arith.constant 0 : i32
    return %arg0, %arg1 : i32, i32
  }
}

</mosaic_0001>

<bundles_post_ra>
// kernel: tpu_custom_call.1
= control target key start
LH: loop header
LB: loop body
LE: loop exit
PB: predicated region body
PF: predicated region fallthrough
CT: control target
= control target key end

     0   :  { %8 = vsyncpa [#allocation4], 0  ;;  %s319_s0 = inlined_call_operand.hbm [shape: f32[16,32], index: 0, kind: input, shape index: {}]   ;;  %s320_s1 = inlined_call_operand.hbm [shape: f32[32,96], index: 1, kind: input, shape index: {}]   ;;  %s321_s2 = inlined_call_operand.vmem [shape: f32[1,96], index: 2, kind: input, shape index: {}]   ;;  %s322_s3 = inlined_call_operand.hbm [shape: f32[16,96], index: 3, kind: output, shape index: {}]  }
   0x1   :  { %9 = vsyncpa [#allocation7], 0 }
   0x2   :  { %10 = vsyncpa [#allocation5], 0  ;;  %s238_s12 = smov [#allocation3]   ;;  %s166_s16 = scalar_lea.hbm %s319_s0, 256 }
   0x3   :  { %s16_s13 = sshll.u32 %s238_s12, 4  ;;  %p167_p0 = scmp.ne.s32.totalorder %s319_s0, %s166_s16  ;;  %s17_s13 = int_to_ptr.vmem [resolvable:$true] %s16_s13 }
   0x4   :  { %p170_p1 = scmp.lt.u32.totalorder %s166_s16, %s319_s0 }
   0x6   :  { %p172_p2 = pnand %p170_p1, %p167_p0 }
   0x8   :  { %175 = shalt.err (!%p172_p2)
}
   0x9   :  { %s176_s21 = scalar_lea.vmem %s17_s13, 256  ;;  %p181_p4 = scmp.lt.s32.totalorder %s17_s13, %s17_s13 }
   0xa   :  { %p177_p3 = scmp.ne.s32.totalorder %s17_s13, %s176_s21  ;;  %p182_p5 = scmp.lt.s32.totalorder %s176_s21, %s176_s21 }
   0xc   :  { %p183_p6 = por %p182_p5, %p181_p4 }
   0xe   :  { %p184_p7 = pnand %p183_p6, %p177_p3 }
  0x10   :  { %187 = shalt.err (!%p184_p7)
}
  0x11   :  { %s239_s22 = smov 128   ;;  %s240_s23 = smov 8  }
  0x12   :  { %22 = dma.hbm_to_vmem [thread:$0]  %s319_s0, 256, %s17_s13, [#allocation4], %s239_s22, %s239_s22, %s240_s23  }
  0x13   :  { %s241_s26 = smov [#allocation6]   ;;  %s188_s30 = scalar_lea.hbm %s320_s1, 512 }
  0x14   :  { %s28_s27 = sshll.u32 %s241_s26, 4  ;;  %p189_p8 = scmp.ne.s32.totalorder %s320_s1, %s188_s30  ;;  %s29_s27 = int_to_ptr.vmem [resolvable:$true] %s28_s27 }
  0x15   :  { %p192_p9 = scmp.lt.u32.totalorder %s188_s30, %s320_s1 }
  0x17   :  { %p194_p10 = pnand %p192_p9, %p189_p8 }
  0x19   :  { %197 = shalt.err (!%p194_p10)
}
  0x1a   :  { %s198_s8 = scalar_lea.vmem %s29_s27, 512  ;;  %p203_p12 = scmp.lt.s32.totalorder %s29_s27, %s29_s27 }
  0x1b   :  { %p199_p11 = scmp.ne.s32.totalorder %s29_s27, %s198_s8  ;;  %p204_p13 = scmp.lt.s32.totalorder %s198_s8, %s198_s8 }
  0x1d   :  { %p205_p0 = por %p204_p13, %p203_p12 }
  0x1f   :  { %p206_p1 = pnand %p205_p0, %p199_p11 }
  0x21   :  { %209 = shalt.err (!%p206_p1)
}
  0x22   :  { %34 = dma.hbm_to_vmem [thread:$0]  %s320_s1, 512, %s29_s27, [#allocation7], %s239_s22, %s239_s22, %s240_s23  }
  0x23   :  { %232 = dma.done.wait [#allocation4], 256  }
  0x24   :  { %233 = vsyncadd [#allocation4], 4294967040 }
  0x25   :  { %234 = dma.done.wait [#allocation7], 512  }
  0x26   :  { %235 = vsyncadd [#allocation7], 4294966784  ;;  %vm48_vm0 = vcmask 785408   ;;  %v242_v0 = vmov 0.0   ;;  %vm243_vm1 = vmmov 0   ;;  %v56_v1 = vld [vmem:[#allocation6] sm:$0xff] }
  0x27   :  { %49 = vst.msk [vmem:[#allocation2] sm:$0xff] %vm48_vm0, %v242_v0  ;;  %50 = vst.msk [vmem:[#allocation2 + $0x8] sm:$0xff] %vm48_vm0, %v242_v0  ;;  %151 = vmatprep.subr.bf16.mxu0 %v242_v0  ;;  %155 = vmatprep.mubr.msk.bf16.mxu0 %vm243_vm1, %v242_v0  ;;  %v57_v2 = vld [vmem:[#allocation6 + $0x8] sm:$0xff]  ;;  %v58_v3 = vld [vmem:[#allocation6 + $0x10] sm:$0xff]  ;;  %vm62_vm2 = vcmask 261120   ;;  %s244_s11 = smov [#allocation8]  }
  0x28   :  { %v60_v4 = vpack.c.bf16 %v57_v2, %v56_v1  ;;  %v59_v5 = vld [vmem:[#allocation6 + $0x18] sm:$0xff]  ;;  %v53_v7 = vld [vmem:[#allocation3] sm:$0xff]  ;;  %v147_v18 = vld [vmem:[%s321_s2] ss:$0 sm:$0xff]  ;;  %s133_s12 = sshll.u32 %s244_s11, 4  ;;  %s134_s12 = int_to_ptr.vmem [resolvable:$true] %s133_s12 }
  0x29   :  { %v61_v6 = vpack.c.bf16 %v59_v5, %v58_v3  ;;  %v54_v8 = vld [vmem:[#allocation3 + $0x8] sm:$0xff]  ;;  %s210_s13 = scalar_lea.vmem %s134_s12, 256  ;;  %p215_p3 = scmp.lt.s32.totalorder %s134_s12, %s134_s12 }
  0x2a   :  { %152 = vmatpush3.bf16.msra.mxu0 %v60_v4  ;;  %v55_v9 = vpack.c.bf16 %v54_v8, %v53_v7  ;;  %p211_p2 = scmp.ne.s32.totalorder %s134_s12, %s210_s13  ;;  %p216_p4 = scmp.lt.s32.totalorder %s210_s13, %s210_s13 }
  0x2b   :  { %153 = vmatprep.subr.bf16.mxu0 %v242_v0 }
  0x2c   :  { %p217_p5 = por %p216_p4, %p215_p3 }
  0x2e   :  { %154 = vmatpush3.bf16.msra.mxu0 %v61_v6  ;;  %v51_v10 = vld [vmem:[#allocation2] sm:$0xff]  ;;  %v52_v12 = vld [vmem:[#allocation2 + $0x8] sm:$0xff]  ;;  %p218_p6 = pnand %p217_p5, %p211_p2 }
  0x31   :  { %156 = vmatmul.mubr.msk.bf16.vlgmr.msra.gmra.mrb[0].mxu0 %vm62_vm2, %v55_v9 }
 0x104   :  { %v100_v11 = vpop.f32.mrb[0].mxu0 }
 0x105   :  { %v107_v13 = vadd.f32 %v100_v11, %v51_v10  ;;  %v157_v14 = vpop.f32.mrb[1].mxu0 }
 0x106   :  { %v103_v15 = vpop.f32.mrb[2].mxu0 }
 0x107   :  { %110 = vst.msk [vmem:[#allocation2] sm:$0xff] %vm48_vm0, %v107_v13  ;;  %v108_v16 = vadd.f32 %v103_v15, %v52_v12  ;;  %v158_v17 = vpop.f32.mrb[3].mxu0 }
 0x109   :  { %111 = vst.msk [vmem:[#allocation2 + $0x8] sm:$0xff] %vm48_vm0, %v108_v16 }
 0x10e   :  { %v115_v19 = vld [vmem:[#allocation2] sm:$0xff] }
 0x10f   :  { %v124_v20 = vadd.f32 %v147_v18, %v115_v19 }
 0x110   :  { %v116_v21 = vld [vmem:[#allocation2 + $0x8] sm:$0xff] }
 0x111   :  { %v125_v22 = vadd.f32 %v147_v18, %v116_v21  ;;  %126 = vst.msk [vmem:[#allocation8] sm:$0xff] %vm48_vm0, %v124_v20 }
 0x113   :  { %127 = vst.msk [vmem:[#allocation8 + $0x8] sm:$0xff] %vm48_vm0, %v125_v22 }
 0x114   :  { %221 = shalt.err (!%p218_p6)
}
 0x115   :  { %s222_s15 = scalar_lea.hbm %s322_s3, 256 }
 0x116   :  { %p223_p7 = scmp.ne.s32.totalorder %s322_s3, %s222_s15  ;;  %p226_p8 = scmp.lt.u32.totalorder %s222_s15, %s322_s3 }
 0x118   :  { %p228_p9 = pnand %p226_p8, %p223_p7 }
 0x11a   :  { %231 = shalt.err (!%p228_p9)
}
 0x11b   :  { %139 = dma.vmem_to_hbm [thread:$0]  %s134_s12, 256, %s322_s3, [#allocation5], %s239_s22, %s239_s22, %s240_s23  }
 0x11c   :  { %236 = dma.done.wait [#allocation5], 256  }
 0x11d   :  { %237 = vsyncadd [#allocation5], 4294967040 }
 0x11e   :  { %143 = vsyncpa [#allocation4], 1 }
 0x11f   :  { %144 = vsyncpa [#allocation7], 1 }
 0x120   :  { %145 = vsyncpa [#allocation5], 1 }

</bundles_post_ra>
